<compile_context>
chip_gen: v7x
topology: tpu7x:2x2x1
jax: 0.10.0
libtpu: 0.0.40
codegen_flags: <defaults>
</compile_context>

<pallas_src>
import jax
import jax.numpy as jnp
from jax.experimental import pallas as pl
from jax.experimental.pallas import tpu as pltpu


def _se_kernel(x_ref, w1_ref, b1_ref, w2_ref, b2_ref, o_ref):
    """One batch element per grid step.

    x_ref : (1, C, H*W)   input slab (lane axis = flattened spatial)
    w1_ref: (C, mid_p)    first Linear, transposed, mid zero-padded to 128-mult
    b1_ref: (1, mid_p)
    w2_ref: (mid_p, C)    second Linear, transposed
    b2_ref: (1, C)
    o_ref : (1, C, H*W)
    """
    x = x_ref[...].astype(jnp.float32)                        # (1, C, HW)

    # Global average pool == AvgPool2d(kernel=H=W, stride=1): lane reduction.
    pooled = jnp.mean(x, axis=-1)                              # (1, C)

    # Linear(C -> mid) + ReLU6.  Padded mid columns give relu6(0 + 0) = 0.
    h = jnp.dot(pooled, w1_ref[...], preferred_element_type=jnp.float32)
    h = jnp.clip(h + b1_ref[...], 0.0, 6.0)                    # (1, mid_p)

    # Linear(mid -> C) + HardSwish gate (s * relu6(s + 3) / 6).
    s = jnp.dot(h, w2_ref[...], preferred_element_type=jnp.float32)
    s = s + b2_ref[...]                                        # (1, C)
    s = s * jnp.clip(s + 3.0, 0.0, 6.0) * (1.0 / 6.0)

    # Per-(batch, channel) gate broadcast along the spatial (lane) axis.
    o_ref[...] = (x * s[:, :, None]).astype(o_ref.dtype)


def squeeze_and_excite(x, w1, b1, w2, b2, *, se_kernel_size=None,
                       donate_x=False):
    """MobileNetV3 SqueezeAndExcite forward.

    x : (B, C, H, W) float (NCHW, same as the PyTorch module)
    w1: (mid, C), b1: (mid,)   -- PyTorch nn.Linear layout (out_feat, in_feat)
    w2: (C, mid), b2: (C,)
    Returns (B, C, H, W).
    """
    B, C, H, W = x.shape
    mid = w1.shape[0]
    if se_kernel_size is not None and not (H == W == se_kernel_size):
        raise ValueError(
            "SqueezeAndExcite requires se_kernel_size == H == W (the PyTorch "
            f"module only works in that regime); got H={H}, W={W}, "
            f"se_kernel_size={se_kernel_size}")
    assert w1.shape == (mid, C) and b1.shape == (mid,)
    assert w2.shape == (C, mid) and b2.shape == (C,)

    HW = H * W
    x_flat = x.reshape(B, C, HW)                       # free view of NCHW

    # Pad the squeeze width to a lane-dense multiple of 128 (zeros are inert).
    mid_p = max(128, ((mid + 127) // 128) * 128)
    pad = mid_p - mid
    w1_t = jnp.pad(jnp.transpose(w1).astype(jnp.float32), ((0, 0), (0, pad)))   # (C, mid_p)
    b1_r = jnp.pad(b1.astype(jnp.float32).reshape(1, mid), ((0, 0), (0, pad)))  # (1, mid_p)
    w2_t = jnp.pad(jnp.transpose(w2).astype(jnp.float32), ((0, pad), (0, 0)))   # (mid_p, C)
    b2_r = b2.astype(jnp.float32).reshape(1, C)                                 # (1, C)

    # VMEM budget: in + out slabs (double-buffered) plus resident weights.
    block_bytes = C * HW * x.dtype.itemsize
    weight_bytes = 4 * (w1_t.size + b1_r.size + w2_t.size + b2_r.size)
    vmem_needed = 4 * block_bytes + 2 * weight_bytes + (2 << 20)
    vmem_limit = int(min(max(vmem_needed, 32 << 20), 64 << 20))

    kwargs = {}
    if donate_x:
        # Output has the same shape/dtype as x; reuse its HBM buffer when the
        # caller can donate it (avoids a second HBM allocation).
        kwargs["input_output_aliases"] = {0: 0}

    out_flat = pl.pallas_call(
        _se_kernel,
        out_shape=jax.ShapeDtypeStruct((B, C, HW), x.dtype),
        grid=(B,),
        in_specs=[
            pl.BlockSpec((1, C, HW), lambda b: (b, 0, 0)),   # x: one batch/step
            pl.BlockSpec((C, mid_p), lambda b: (0, 0)),      # grid-invariant
            pl.BlockSpec((1, mid_p), lambda b: (0, 0)),
            pl.BlockSpec((mid_p, C), lambda b: (0, 0)),
            pl.BlockSpec((1, C), lambda b: (0, 0)),
        ],
        out_specs=pl.BlockSpec((1, C, HW), lambda b: (b, 0, 0)),
        compiler_params=pltpu.CompilerParams(
            dimension_semantics=("parallel",),   # shard batch over v7x's 2 TCs
            vmem_limit_bytes=vmem_limit),
        **kwargs,
    )(x_flat, w1_t, b1_r, w2_t, b2_r)

    return out_flat.reshape(B, C, H, W)


def _reference(x, w1, b1, w2, b2):
    """Pure-JAX mirror of the PyTorch forward."""
    pooled = jnp.mean(x, axis=(2, 3))                          # (B, C)
    h = jnp.clip(pooled @ w1.T + b1, 0.0, 6.0)                 # ReLU6
    s = h @ w2.T + b2
    s = s * jnp.clip(s + 3.0, 0.0, 6.0) / 6.0                  # HardSwish
    return s[:, :, None, None] * x


if __name__ == "__main__":
    # Module config: in_channels=8, out_channels=8, se_kernel_size=16, divide=4.
    B, C, H, W = 2, 8, 16, 16
    mid = C // 4

    key = jax.random.PRNGKey(0)
    kx, k1, k2, k3, k4 = jax.random.split(key, 5)
    x = jax.random.normal(kx, (B, C, H, W), dtype=jnp.float32)
    w1 = jax.random.normal(k1, (mid, C), dtype=jnp.float32) * 0.3   # Linear(C->mid)
    b1 = jax.random.normal(k2, (mid,), dtype=jnp.float32) * 0.1
    w2 = jax.random.normal(k3, (C, mid), dtype=jnp.float32) * 0.3   # Linear(mid->C)
    b2 = jax.random.normal(k4, (C,), dtype=jnp.float32) * 0.1

    out = squeeze_and_excite(x, w1, b1, w2, b2, se_kernel_size=H)
    out = jax.block_until_ready(out)

    ref = _reference(x, w1, b1, w2, b2)
    assert out.shape == (B, C, H, W)
    assert jnp.allclose(out, ref, atol=1e-5, rtol=1e-5), "mismatch vs reference"

    print("KERNEL_OK")
</pallas_src>

<mosaic_0001>
module attributes {stable_mosaic.version = 11 : i64} {
  func.func @_se_kernel(%arg0: i32, %arg1: memref<1x8x256xf32, #tpu.memory_space<vmem>>, %arg2: memref<8x128xf32, #tpu.memory_space<vmem>>, %arg3: memref<1x128xf32, #tpu.memory_space<vmem>>, %arg4: memref<128x8xf32, #tpu.memory_space<vmem>>, %arg5: memref<1x8xf32, #tpu.memory_space<vmem>>, %arg6: memref<1x8x256xf32, #tpu.memory_space<vmem>>) attributes {dimension_semantics = [#tpu.dimension_semantics<parallel>], iteration_bounds = array<i64: 2>, scalar_prefetch = 0 : i64, scratch_operands = 0 : i64, tpu.core_type = #tpu.core_type<tc>, window_params = [{transform_indices = @transform_0, window_bounds = array<i64: 1, 8, 256>}, {pipeline_mode = #tpu.pipeline_mode<synchronous>, transform_indices = @transform_1, window_bounds = array<i64: 8, 128>}, {pipeline_mode = #tpu.pipeline_mode<synchronous>, transform_indices = @transform_2, window_bounds = array<i64: 1, 128>}, {pipeline_mode = #tpu.pipeline_mode<synchronous>, transform_indices = @transform_3, window_bounds = array<i64: 128, 8>}, {pipeline_mode = #tpu.pipeline_mode<synchronous>, transform_indices = @transform_4, window_bounds = array<i64: 1, 8>}, {transform_indices = @transform_5, window_bounds = array<i64: 1, 8, 256>}]} {
    %c0 = arith.constant 0 : index
    %c0_0 = arith.constant 0 : index
    %c0_1 = arith.constant 0 : index
    %0 = vector.load %arg1[%c0, %c0_0, %c0_1] : memref<1x8x256xf32, #tpu.memory_space<vmem>>, vector<1x8x256xf32>
    %cst = arith.constant dense<0.000000e+00> : vector<1x8xf32>
    %1 = vector.multi_reduction <add>, %0, %cst [2] : vector<1x8x256xf32> to vector<1x8xf32>
    %cst_2 = arith.constant 2.560000e+02 : f32
    %2 = vector.broadcast %cst_2 : f32 to vector<1x8xf32>
    %3 = arith.divf %1, %2 : vector<1x8xf32>
    %c0_3 = arith.constant 0 : index
    %c0_4 = arith.constant 0 : index
    %4 = vector.load %arg2[%c0_3, %c0_4] : memref<8x128xf32, #tpu.memory_space<vmem>>, vector<8x128xf32>
    %cst_5 = arith.constant dense<0.000000e+00> : vector<1x128xf32>
    %5 = tpu.matmul %3, %4, %cst_5 {dimension_numbers = #tpu.dot_dimension_numbers<[1], [0], [0], [1], [0, 0, 1, 1], [], []>} : vector<1x8xf32>, vector<8x128xf32>, vector<1x128xf32> -> vector<1x128xf32>
    %c0_6 = arith.constant 0 : index
    %c0_7 = arith.constant 0 : index
    %6 = vector.load %arg3[%c0_6, %c0_7] : memref<1x128xf32, #tpu.memory_space<vmem>>, vector<1x128xf32>
    %7 = arith.addf %5, %6 : vector<1x128xf32>
    %cst_8 = arith.constant 0.000000e+00 : f32
    %cst_9 = arith.constant 6.000000e+00 : f32
    %8 = vector.broadcast %cst_8 : f32 to vector<1x128xf32>
    %9 = arith.maximumf %8, %7 : vector<1x128xf32>
    %10 = vector.broadcast %cst_9 : f32 to vector<1x128xf32>
    %11 = arith.minimumf %10, %9 : vector<1x128xf32>
    %c0_10 = arith.constant 0 : index
    %c0_11 = arith.constant 0 : index
    %12 = vector.load %arg4[%c0_10, %c0_11] : memref<128x8xf32, #tpu.memory_space<vmem>>, vector<128x8xf32>
    %cst_12 = arith.constant dense<0.000000e+00> : vector<1x8xf32>
    %13 = tpu.matmul %11, %12, %cst_12 {dimension_numbers = #tpu.dot_dimension_numbers<[1], [0], [0], [1], [0, 0, 1, 1], [], []>} : vector<1x128xf32>, vector<128x8xf32>, vector<1x8xf32> -> vector<1x8xf32>
    %c0_13 = arith.constant 0 : index
    %c0_14 = arith.constant 0 : index
    %14 = vector.load %arg5[%c0_13, %c0_14] : memref<1x8xf32, #tpu.memory_space<vmem>>, vector<1x8xf32>
    %15 = arith.addf %13, %14 : vector<1x8xf32>
    %cst_15 = arith.constant 3.000000e+00 : f32
    %16 = vector.broadcast %cst_15 : f32 to vector<1x8xf32>
    %17 = arith.addf %15, %16 : vector<1x8xf32>
    %cst_16 = arith.constant 0.000000e+00 : f32
    %cst_17 = arith.constant 6.000000e+00 : f32
    %18 = vector.broadcast %cst_16 : f32 to vector<1x8xf32>
    %19 = arith.maximumf %18, %17 : vector<1x8xf32>
    %20 = vector.broadcast %cst_17 : f32 to vector<1x8xf32>
    %21 = arith.minimumf %20, %19 : vector<1x8xf32>
    %22 = arith.mulf %15, %21 : vector<1x8xf32>
    %cst_18 = arith.constant 0.166666672 : f32
    %23 = vector.broadcast %cst_18 : f32 to vector<1x8xf32>
    %24 = arith.mulf %22, %23 : vector<1x8xf32>
    %25 = vector.shape_cast %24 : vector<1x8xf32> to vector<1x8x1xf32>
    %26 = vector.broadcast %25 : vector<1x8x1xf32> to vector<1x8x256xf32>
    %27 = arith.mulf %0, %26 : vector<1x8x256xf32>
    %c0_19 = arith.constant 0 : index
    %c0_20 = arith.constant 0 : index
    %c0_21 = arith.constant 0 : index
    %28 = vector.load %arg6[%c0_19, %c0_20, %c0_21] : memref<1x8x256xf32, #tpu.memory_space<vmem>>, vector<1x8x256xf32>
    tpu.vector_store %arg6[%c0_19, %c0_20, %c0_21], %27 {strides = array<i32>} : memref<1x8x256xf32, #tpu.memory_space<vmem>>, vector<1x8x256xf32>,
    return
  }
  func.func @transform_0(%arg0: i32) -> (i32, i32, i32) {
    %c0_i32 = arith.constant 0 : i32
    %c0_i32_0 = arith.constant 0 : i32
    %c0_i32_1 = arith.constant 0 : i32
    return %arg0, %c0_i32, %c0_i32_0 : i32, i32, i32
  }
  func.func @transform_1(%arg0: i32) -> (i32, i32) {
    %c0_i32 = arith.constant 0 : i32
    %c0_i32_0 = arith.constant 0 : i32
    %c0_i32_1 = arith.constant 0 : i32
    return %c0_i32, %c0_i32_0 : i32, i32
  }
  func.func @transform_2(%arg0: i32) -> (i32, i32) {
    %c0_i32 = arith.constant 0 : i32
    %c0_i32_0 = arith.constant 0 : i32
    %c0_i32_1 = arith.constant 0 : i32
    return %c0_i32, %c0_i32_0 : i32, i32
  }
  func.func @transform_3(%arg0: i32) -> (i32, i32) {
    %c0_i32 = arith.constant 0 : i32
    %c0_i32_0 = arith.constant 0 : i32
    %c0_i32_1 = arith.constant 0 : i32
    return %c0_i32, %c0_i32_0 : i32, i32
  }
  func.func @transform_4(%arg0: i32) -> (i32, i32) {
    %c0_i32 = arith.constant 0 : i32
    %c0_i32_0 = arith.constant 0 : i32
    %c0_i32_1 = arith.constant 0 : i32
    return %c0_i32, %c0_i32_0 : i32, i32
  }
  func.func @transform_5(%arg0: i32) -> (i32, i32, i32) {
    %c0_i32 = arith.constant 0 : i32
    %c0_i32_0 = arith.constant 0 : i32
    %c0_i32_1 = arith.constant 0 : i32
    return %arg0, %c0_i32, %c0_i32_0 : i32, i32, i32
  }
}

</mosaic_0001>

<bundles_post_ra>
// kernel: tpu_custom_call.1
= control target key start
LH: loop header
LB: loop body
LE: loop exit
PB: predicated region body
PF: predicated region fallthrough
CT: control target
= control target key end

     0   :  { %10 = vsyncpa [#allocation3], 0  ;;  %s894_s0 = inlined_call_operand.vmem [shape: f32[2,8,256], index: 0, kind: input, shape index: {}]   ;;  %s895_s1 = inlined_call_operand.vmem [shape: f32[8,128], index: 1, kind: input, shape index: {}]   ;;  %s896_s2 = inlined_call_operand.vmem [shape: f32[1,128], index: 2, kind: input, shape index: {}]   ;;  %s897_s3 = inlined_call_operand.vmem [shape: f32[128,8], index: 3, kind: input, shape index: {}]   ;;  %s898_s4 = inlined_call_operand.vmem [shape: f32[1,8], index: 4, kind: input, shape index: {}]   ;;  %s899_s5 = inlined_call_operand.hbm [shape: f32[2,8,256], index: 5, kind: output, shape index: {}]  }
   0x1   :  { %12 = vsyncpa [#allocation3 + $0x1], 0  ;;  %s729_s18 = smov 0   ;;  %s731_s19 = smov 0  }
   0x2   :  { %s733_s20 = smov 0   ;;  %s735_s21 = smov 0  }
   0x3 LB: > { %s750_s22 = sadd.s32 4294967295, %s693_s21   ;;  %s491_s23 = sadd.s32 4294967294, %s693_s21   ;;  %s693_s21 = sphi %s735_s21, %s905_s21   ;;  %s689_s20 = sphi %s733_s20, %s904_s20   ;;  %s685_s19 = sphi %s731_s19, %s903_s19   ;;  %s681_s18 = sphi %s729_s18, %s902_s18  }
   0x4   : > { %s754_s24 = sadd.s32 1, %s693_s21   ;;  %s135_s25 = sadd.s32 1, %s689_s20 }
   0x5   : > { %s132_s26 = ssub.s32 %s693_s21, %s754_s24  ;;  %p145_p0 = scmp.ne.s32.totalorder %s689_s20, %s685_s19 }
   0x6   : > { %p133_p1 = scmp.eq.s32.totalorder %s132_s26, 0  ;;  %p146_p2 = scmp.eq.s32.totalorder %s750_s22, 1 }
   0x7   : > { %p151_p3 = scmp.ne.s32.totalorder %s685_s19, %s681_s18  ;;  %p152_p4 = scmp.eq.s32.totalorder %s491_s23, 1 }
   0x8   : > { %s765_s27 = scalar_select %p133_p1, %s689_s20, %s135_s25  }
   0x9   : > { %p767_p5 = por %p146_p2, %p145_p0  ;;  %p771_p6 = por %p152_p4, %p151_p3 }
   0xa   : > { %p494_p7 = scmp.ge.s32.totalorder %s693_s21, 1  ;;  %p190_p8 = scmp.lt.s32.totalorder %s693_s21, 3 }
   0xc   : > { %p191_p9 = pnand %p494_p7, %p190_p8 }
   0xd   : > { %p218_p10 = scmp.lt.s32.totalorder (!%p191_p9), %s750_s22, 1  ;;  %v695_v3 = vmov (!%p191_p9), 0.0   ;;  %v230_v4 = vld [vmem:[%s895_s1] sm:$0xff] (!%p191_p9)  ;;  %vm696_vm0 = vmmov (!%p191_p9), 0   ;;  %v315_v6 = vld [vmem:[%s897_s3 + $0x8] sm:$0xff] (!%p191_p9)  ;;  %v316_v7 = vld [vmem:[%s897_s3 + $0x10] sm:$0xff] (!%p191_p9)  ;;  %v233_v24 = vlaneseq (!%p191_p9) }
   0xe   : > { %194 = sbr.rel (%p191_p9) target bundleno = 749 (0x2ed), region = 40  ;;  %525 = vmatprep.subr.mxu0 (!%p191_p9), %v695_v3  ;;  %527 = vmatprep.mubr.msk.f32.mxu0 (!%p191_p9), %vm696_vm0, %v695_v3  ;;  %v314_v5 = vld [vmem:[%s897_s3] sm:$0xff] (!%p191_p9)  ;;  %v697_v8 = vmov (!%p191_p9), 0.0|0.0   ;;  %v317_v10 = vld [vmem:[%s897_s3 + $0x18] sm:$0xff] (!%p191_p9)  ;;  %v319_v13 = vld [vmem:[%s897_s3 + $0x28] sm:$0xff] (!%p191_p9)  ;;  %vm239_vm1 = vcmask (!%p191_p9), 64512  }
   0xf   : > { %526 = vmatpush3.msra.mxu0 (!%p191_p9), %v230_v4  ;;  %562 = vmatprep.mubr.msk.f32.mxu1 (!%p191_p9), %vm696_vm0, %v695_v3  ;;  %v566_v9 = vpack.c.bf16 (!%p191_p9), %v315_v6, %v314_v5  ;;  %v569_v11 = vpack.c.bf16 (!%p191_p9), %v317_v10, %v316_v7  ;;  %v318_v12 = vld [vmem:[%s897_s3 + $0x20] sm:$0xff] (!%p191_p9)  ;;  %v320_v15 = vld [vmem:[%s897_s3 + $0x30] sm:$0xff] (!%p191_p9)  ;;  %v321_v16 = vld [vmem:[%s897_s3 + $0x38] sm:$0xff] (!%p191_p9)  ;;  %v234_v25 = vand.u32 (!%p191_p9), 127, %v233_v24  ;;  %v236_v26 = vshrl.u32 (!%p191_p9), %v233_v24, 7  ;;  %s215_s16 = sand.u32 (!%p191_p9), 1, %s685_s19  }
  0x10   : > { %565 = vmatprep.subr.bf16.mxu1 (!%p191_p9), %v697_v8  ;;  %v572_v14 = vpack.c.bf16 (!%p191_p9), %v319_v13, %v318_v12  ;;  %v575_v17 = vpack.c.bf16 (!%p191_p9), %v321_v16, %v320_v15  ;;  %v322_v18 = vld [vmem:[%s897_s3 + $0x40] sm:$0xff] (!%p191_p9)  ;;  %v323_v19 = vld [vmem:[%s897_s3 + $0x48] sm:$0xff] (!%p191_p9)  ;;  %v324_v21 = vld [vmem:[%s897_s3 + $0x50] sm:$0xff] (!%p191_p9)  ;;  %s495_s17 = sshll.u32 (!%p191_p9), %s215_s16, 4  ;;  %s505_s23 = sshll.u32 (!%p191_p9), %s750_s22, 8 }
  0x11   : > { %567 = vmatpush3.bf16.msra.mxu1 (!%p191_p9), %v566_v9  ;;  %v578_v20 = vpack.c.bf16 (!%p191_p9), %v323_v19, %v322_v18  ;;  %v325_v22 = vld [vmem:[%s897_s3 + $0x58] sm:$0xff] (!%p191_p9)  ;;  %v237_v27 = vsub.s32 (!%p191_p9), %v234_v25, %v236_v26  ;;  %v326_v31 = vld [vmem:[%s897_s3 + $0x60] sm:$0xff] (!%p191_p9)  ;;  %v327_v32 = vld [vmem:[%s897_s3 + $0x68] sm:$0xff] (!%p191_p9)  ;;  %v408_v51 = vsub.s32 (!%p191_p9), 0, %v236_v26  ;;  %s217_s25 = scalar_lea.vmem (!%p191_p9), [#allocation2], %s495_s17  ;;  %s852_s7 = scalar_lea.hbm (!%p191_p9), %s899_s5, %s505_s23 }
  0x12   : > { %568 = vmatprep.subr.bf16.mxu1 (!%p191_p9), %v697_v8  ;;  %v581_v23 = vpack.c.bf16 (!%p191_p9), %v325_v22, %v324_v21  ;;  %v584_v33 = vpack.c.bf16 (!%p191_p9), %v327_v32, %v326_v31  ;;  %v328_v34 = vld [vmem:[%s897_s3 + $0x70] sm:$0xff] (!%p191_p9)  ;;  %v329_v35 = vld [vmem:[%s897_s3 + $0x78] sm:$0xff] (!%p191_p9)  ;;  %v231_v37 = vld [vmem:[%s896_s2] sm:$0x1] (!%p191_p9)  ;;  %s432_s26 = sshll.u32 (!%p191_p9), %s217_s25, 4  ;;  %s854_s26 = int_to_ptr.vmem [resolvable:$true] %s432_s26 }
  0x13   : > { %v587_v36 = vpack.c.bf16 (!%p191_p9), %v329_v35, %v328_v34  ;;  %v330_v43 = vld [vmem:[%s898_s4] sm:$0x1] (!%p191_p9)  ;;  %s631_s8 = scalar_lea.vmem (!%p191_p9), %s854_s26, 256 }
  0x14   : > { %p632_p11 = scmp.ne.s32.totalorder (!%p191_p9), %s854_s26, %s631_s8 }
  0x15   : > { %s219_s30 = scalar_select %p218_p10, %s750_s22, 1  ;;  %570 = vmatpush3.bf16.msra.mxu1 %v569_v11 }
  0x16   : > { %571 = vmatprep.subr.bf16.mxu1 %v697_v8  ;;  %s418_s22 = scalar_lea.sflag [#allocation3], %s215_s16  ;;  %p633_p12 = pnand %p632_p11, %p767_p5 }
  0x17   : > { %s504_s6 = sshll.u32 %s219_s30, 4 }
  0x18   : > { %s222_s9 = scalar_lea.vmem %s894_s0, %s504_s6  ;;  %p634_p13 = pneg %p633_p12 }
  0x19   : > { %v782_v0 = vld [vmem:[%s222_s9] sm:$0xff]  ;;  %v784_v1 = vld [vmem:[%s222_s9 + $0x8] sm:$0xff]  ;;  %573 = vmatpush3.bf16.msra.mxu1 %v572_v14  ;;  %s698_s9 = smov [#allocation2]  }
  0x1a   : > { %v225_v2 = vadd.f32 %v784_v1, %v782_v0  ;;  %574 = vmatprep.subr.bf16.mxu1 %v697_v8  ;;  %s635_s10 = sshll.u32 %s698_s9, 4  ;;  %s636_s10 = int_to_ptr.vmem [resolvable:$false] %s635_s10 }
  0x1b   : > { %s637_s11 = scalar_lea.vmem %s636_s10, 512  ;;  %p638_p0 = scmp.lt.s32.totalorder %s854_s26, %s636_s10 }
  0x1c   : > { %226 = vadd.xlane.f32.xlu0 %v225_v2  ;;  %p639_p1 = scmp.lt.s32.totalorder %s637_s11, %s631_s8 }
  0x1d   : > { %576 = vmatpush3.bf16.msra.mxu1 %v575_v17 }
  0x1e   : > { %577 = vmatprep.subr.bf16.mxu1 %v697_v8  ;;  %p640_p2 = por %p639_p1, %p638_p0 }
  0x20   : > { %p641_p3 = pnand %p640_p2, %p634_p13 }
  0x21   : > { %579 = vmatpush3.bf16.msra.mxu1 %v578_v20 }
  0x22   : > { %580 = vmatprep.subr.bf16.mxu1 %v697_v8 }
  0x25   : > { %582 = vmatpush3.bf16.msra.mxu1 %v581_v23 }
  0x26   : > { %583 = vmatprep.subr.bf16.mxu1 %v697_v8 }
  0x29   : > { %585 = vmatpush3.bf16.msra.mxu1 %v584_v33 }
  0x2a   : > { %586 = vmatprep.subr.bf16.mxu1 %v697_v8 }
  0x2d   : > { %588 = vmatpush3.bf16.msra.mxu1 %v587_v36 }
  0xa9   : > { %v227_v28 = vpop.xlane.xlu0 %226 }
  0xaa   : > { %v229_v29 = vmul.f32 0.00390625, %v227_v28 }
  0xac   : > { %v238_v30 = vrot.slane %v229_v29, %v237_v27 }
  0xae   : > { %528 = vmatmul.mubr.msk.f32.vlgmr.msra.gmra.mrb[0].mxu0 %vm239_vm1, %v238_v30 }
 0x181   : > { %v308_v38 = vpop.f32.mrb[0].mxu0 }
 0x182   : > { %v309_v39 = vadd.f32 %v308_v38, %v231_v37  ;;  %v529_v40 = vpop.f32.mrb[1].mxu0 }
 0x184   : > { %v312_v41 = vmax.f32 %v309_v39, 0.0 }
 0x186   : > { %v313_v42 = vmin.f32 %v312_v41, 6.0 }
 0x188   : > { %563 = vmatmul.mubr.f32.vlgmr.msra.gmra.mrb[0].mxu1 %v313_v42 }
 0x25b   : > { %v397_v44 = vpop.f32.mrb[0].mxu1 }
 0x25c   : > { %v398_v45 = vadd.f32 %v397_v44, %v330_v43  ;;  %v564_v46 = vpop.f32.mrb[1].mxu1 }
 0x25e   : > { %v401_v47 = vadd.f32 3.0, %v398_v45 }
 0x260   : > { %v402_v48 = vmax.f32 %v401_v47, 0.0 }
 0x262   : > { %v403_v49 = vmin.f32 %v402_v48, 6.0 }
 0x264   : > { %v404_v50 = vmul.f32 %v403_v49, %v398_v45 }
 0x266   : > { %v405_v52 = vmul.f32 0.16666667, %v404_v50 }
 0x268   : > { %v409_v53 = vrot.slane %v405_v52, %v408_v51 }
 0x26a   : > { %411 = vbcast.lane.b32.xlu0 %v409_v53, 256 }
 0x2dc   : > { %v412_v54 = vpop.permute.xlu0 %411 }
 0x2dd   : > { %v413_v55 = vmul.f32 %v412_v54, %v782_v0  ;;  %v414_v56 = vmul.f32 %v412_v54, %v784_v1 }
 0x2df   : > { %415 = vst [vmem:[%s217_s25] sm:$0xff] %v413_v55  ;;  %416 = vst [vmem:[%s217_s25 + $0x8] sm:$0xff] %v414_v56 }
 0x2e0   : > { %644 = shalt.err (!%p641_p3)
}
 0x2e1   : > { %s645_s12 = scalar_lea.hbm %s852_s7, 256  ;;  %s649_s15 = scalar_lea.hbm %s899_s5, 512 }
 0x2e2   : > { %p646_p4 = scmp.ne.s32.totalorder %s852_s7, %s645_s12  ;;  %p650_p9 = scmp.lt.u32.totalorder %s852_s7, %s899_s5 }
 0x2e3   : > { %p651_p10 = scmp.lt.u32.totalorder %s649_s15, %s645_s12  ;;  %p653_p12 = scmp.lt.u32.totalorder %s645_s12, %s852_s7 }
 0x2e4   : > { %p647_p7 = pnand %p646_p4, %p767_p5 }
 0x2e5   : > { %p652_p11 = por %p651_p10, %p650_p9 }
 0x2e6   : > { %p648_p8 = pneg %p647_p7 }
 0x2e7   : > { %p654_p13 = por %p653_p12, %p652_p11 }
 0x2e9   : > { %p655_p0 = pnand %p654_p13, %p648_p8 }
 0x2eb   : > { %658 = shalt.err (!%p655_p0)
}
 0x2ec   : > { %589 = dma.vmem_to_hbm [thread:$0]  (%p767_p5), %s854_s26, 256, %s852_s7, %s418_s22  }
 0x2ed PF: > { %p595_p1 = scmp.ge.s32.totalorder %s693_s21, 2  ;;  %s444_s23 = sand.u32 1, %s681_s18  }
 0x2ee   : > { %s445_s25 = scalar_lea.sflag [#allocation3], %s444_s23 }
 0x2ef   : > { %p592_p2 = pnand %p595_p1, %p771_p6 }
 0x2f1   : > { %676 = dma.done.wait (!%p592_p2), %s445_s25, 256  }
 0x2f2   : > { %678 = vsyncadd (!%p592_p2), %s445_s25, 4294967040  ;;  %p15_p3 = scmp.ge.s32.totalorder %s754_s24, 4   ;;  %s902_s18 = smov %s685_s19 }
 0x2f3   : > { %s903_s19 = smov %s689_s20  ;;  %s904_s20 = smov %s765_s27 }
 0x2f4   : > { %s905_s21 = smov %s754_s24  ;;  %17 = sbr.rel (!%p15_p3) target bundleno = 3 (0x3), region = 75 }
 0x2fb   :  { %450 = vsyncpa [#allocation3], 1 }
 0x2fc   :  { %452 = vsyncpa [#allocation3 + $0x1], 1 }

</bundles_post_ra>
